<compile_context>
chip_gen: v7x
topology: tpu7x:2x2x1
jax: 0.10.0
libtpu: 0.0.40
codegen_flags: <defaults>
</compile_context>

<pallas_src>
import functools

import numpy as np
import jax
import jax.numpy as jnp
from jax import lax
from jax.experimental import pallas as pl
from jax.experimental.pallas import tpu as pltpu


# ----------------------------- small helpers -----------------------------
def _round_up(x, m):
    return ((x + m - 1) // m) * m


def _cdiv(a, b):
    return -(-a // b)


def _preferred_exp_dtype():
    """bf16 exp on chips with bf16 EUP/VPU paths (v6e/v7x), f32 elsewhere (v5e)."""
    try:
        kind = jax.devices()[0].device_kind.lower()
    except Exception:
        return jnp.float32
    if "v6" in kind or "v7" in kind:
        return jnp.bfloat16
    return jnp.float32


def _vmem_budget_bytes():
    """~80% of physical VMEM: ~51 MiB on v7x (64 MiB), ~102 MiB on v5e/v6e (128 MiB)."""
    phys = None
    try:
        phys = int(pltpu.get_tpu_info().vmem_capacity_bytes)
    except Exception:
        phys = None
    if not phys:
        try:
            kind = jax.devices()[0].device_kind.lower()
        except Exception:
            kind = ""
        phys = (64 << 20) if "v7" in kind else (128 << 20)
    return max(32 << 20, int(phys * 0.8))


def _pick_tile_rows(n, f_pad, itemsize, use_coef, row_mult, vmem_budget, forced=None):
    """Largest row block whose working set fits the per-device VMEM budget."""
    if forced is not None:
        tr = int(forced)
        if tr <= 0 or tr % row_mult != 0:
            raise ValueError(f"tile_rows must be a positive multiple of {row_mult}")
        return tr

    n_pad0 = _round_up(n, row_mult)

    def vmem_needed(tr, n_pad):
        planes = 6                                  # l2 + exp/select temps + masks
        need = n_pad * f_pad * itemsize             # x, resident (constant block, 1x)
        need += planes * tr * n_pad * 4             # [tr, n_pad] f32 working planes
        if use_coef:
            need += 2 * tr * n_pad * 4              # double-buffered coef row block
        return need + (2 << 20)                     # semaphores / Mosaic scratch margin

    for k in range(1, 4096):                        # k = number of row blocks
        tr = _round_up(_cdiv(n_pad0, k), row_mult)
        if vmem_needed(tr, tr * k) <= vmem_budget:
            return tr
    return row_mult


def _linear_coef(b, n_pad):
    """Sparse +-1/B per-pair weighting of the 'mmd_linear' variant, padded to n_pad."""
    # TODO(synk): for very large 2B this dense [n_pad, n_pad] coef should become an
    # in-kernel mask / gather instead of a materialized matrix.
    coef = np.zeros((n_pad, n_pad), dtype=np.float32)
    w = 1.0 / float(b)
    for i in range(b):
        s1, s2 = i, (i + 1) % b
        t1, t2 = s1 + b, s2 + b
        coef[s1, s2] += w
        coef[t1, t2] += w
        coef[s1, t2] -= w
        coef[s2, t1] -= w
    return jnp.asarray(coef)


# ------------------------------- the kernel -------------------------------
def _mmd_kernel(x_ref, *refs, b, n, tile_rows, kernel_mul, kernel_num,
                fix_sigma, exp_dtype, use_coef):
    """One row block of the pairwise plane: gram(MXU) -> multi-bandwidth gaussian
    (EUP) -> signed/coef-weighted partial sum, written as a lane-dense block."""
    if use_coef:
        coef_ref, out_ref = refs
    else:
        coef_ref = None
        (out_ref,) = refs

    f32 = jnp.float32
    n_pad = x_ref.shape[0]

    x_all = x_ref[...]                                            # [n_pad, f_pad]
    if tile_rows == n_pad:                                        # single-tile fast path
        row0 = 0
        x_rows = x_all
    else:
        row0 = pl.multiple_of(pl.program_id(0) * tile_rows, tile_rows)
        x_rows = x_ref[pl.ds(row0, tile_rows), :]                 # [tr, f_pad]

    xa = x_all.astype(f32)
    xr = xa if x_rows is x_all else x_rows.astype(f32)

    sq_a = jnp.sum(xa * xa, axis=1, keepdims=True)                # [n_pad, 1]
    sq_r = sq_a if xr is xa else jnp.sum(xr * xr, axis=1, keepdims=True)

    # Gram block on the MXU; contract dim 1 of both operands (no x.T materialized).
    gram = lax.dot_general(
        x_rows, x_all,
        dimension_numbers=(((1,), (1,)), ((), ())),
        preferred_element_type=f32)                               # [tr, n_pad]
    # Clamp: cancellation can drive the diagonal slightly negative.
    l2 = jnp.maximum(sq_r + sq_a.T - 2.0 * gram, 0.0)

    # Bandwidth: truthiness matches `if self.fix_sigma:`; otherwise closed form over
    # the n valid rows (padded rows are zero, so they contribute to neither term).
    if fix_sigma:
        bandwidth = jnp.asarray(fix_sigma, f32)
    else:
        col_sum = jnp.sum(xa, axis=0, keepdims=True)              # [1, f_pad]
        l2_total = (jnp.float32(2 * n) * jnp.sum(sq_a)
                    - 2.0 * jnp.sum(col_sum * col_sum))
        bandwidth = l2_total / jnp.float32(n * n - n)
    bandwidth = bandwidth / jnp.float32(kernel_mul ** (kernel_num // 2))
    neg_inv_bw0 = -1.0 / bandwidth                                # i = 0 exponent scale
    inv_mul = jnp.float32(1.0 / kernel_mul)

    # Masks from vector iotas, broadcast through comparisons (no [tr,n_pad] int planes).
    r = row0 + lax.broadcasted_iota(jnp.int32, (tile_rows, 1), 0)
    c = lax.broadcasted_iota(jnp.int32, (1, n_pad), 1)
    if use_coef:
        weight = coef_ref[...]                                    # zero on padded pairs
        sign_pos, valid = None, None
    else:
        sign_pos = (r < b) == (c < b)                             # +-1 quadrant sign
        valid = ((r < n) & (c < n)) if n != n_pad else None       # elided when unpadded

    cast = exp_dtype != jnp.float32

    def body(_, carry):
        acc, neg = carry                                          # neg = -1/(bw*mul^i)
        arg = l2 * neg
        if cast:
            e = jnp.exp(arg.astype(exp_dtype)).astype(f32)        # bf16 exp, f32 accum
        else:
            e = jnp.exp(arg)
        if use_coef:
            contrib = weight * e
        else:
            contrib = jnp.where(sign_pos, e, -e)
            if valid is not None:
                contrib = jnp.where(valid, contrib, 0.0)
        return acc + jnp.sum(contrib), neg * inv_mul

    loss, _ = lax.fori_loop(0, kernel_num, body,
                            (jnp.zeros((), f32), neg_inv_bw0), unroll=True)

    # Lane-dense partial-sum block (unmasked vst); the tiny reduction over row blocks
    # is finished in the wrapper.
    out_ref[...] = jnp.zeros((1, 8, 128), f32) + loss


# ------------------------------- the wrapper -------------------------------
class MMDLossPallas:
    def __init__(self, kernel_mul=2.0, kernel_num=5, fix_sigma=None, mmd_type="mmd",
                 exp_dtype=None, tile_rows=None):
        assert fix_sigma is None or isinstance(
            fix_sigma, (int, float, np.integer, np.floating)), \
            "fix_sigma must be a static Python/NumPy scalar (not a traced value)"
        self.kernel_mul = float(kernel_mul)
        self.kernel_num = int(kernel_num)
        self.fix_sigma = fix_sigma
        self.mmd_type = mmd_type
        self.exp_dtype = exp_dtype      # None -> auto (bf16 on v6e/v7x, f32 on v5e)
        self.tile_rows = tile_rows      # None -> auto-pick from the VMEM budget

    def __call__(self, src_features, tar_features):
        assert src_features.shape == tar_features.shape and src_features.ndim == 2
        if self.mmd_type not in ("mmd", "mmd_linear"):
            raise ValueError(f"unknown mmd_type {self.mmd_type}")
        use_coef = self.mmd_type == "mmd_linear"

        b, f = map(int, src_features.shape)
        n = 2 * b
        total = jnp.concatenate([src_features, tar_features], axis=0)   # [2B, F]
        itemsize = total.dtype.itemsize
        row_mult = 8 if itemsize >= 4 else (16 if itemsize == 2 else 32)
        f_pad = _round_up(f, 128)

        exp_dtype = self.exp_dtype if self.exp_dtype is not None else _preferred_exp_dtype()
        vmem_budget = _vmem_budget_bytes()
        tile_rows = _pick_tile_rows(n, f_pad, itemsize, use_coef, row_mult,
                                    vmem_budget, self.tile_rows)
        n_pad = _round_up(n, tile_rows)
        num_tiles = n_pad // tile_rows

        # Zero padding: feature padding does not change distances; padded rows are
        # masked out of the weighting (and contribute nothing to the bandwidth).
        if (n_pad, f_pad) != (n, f):
            total = jnp.pad(total, ((0, n_pad - n), (0, f_pad - f)))

        kernel = functools.partial(
            _mmd_kernel, b=b, n=n, tile_rows=tile_rows,
            kernel_mul=self.kernel_mul, kernel_num=self.kernel_num,
            fix_sigma=self.fix_sigma, exp_dtype=exp_dtype, use_coef=use_coef)

        x_spec = pl.BlockSpec((n_pad, f_pad), lambda i: (0, 0))     # resident across tiles
        out_spec = pl.BlockSpec((1, 8, 128), lambda i: (i, 0, 0))   # lane-dense partials
        out_shape = jax.ShapeDtypeStruct((num_tiles, 8, 128), jnp.float32)

        in_specs = [x_spec]
        args = [total]
        in_bytes = total.size * itemsize
        if use_coef:
            coef = _linear_coef(b, n_pad)
            in_specs.append(pl.BlockSpec((tile_rows, n_pad), lambda i: (i, 0)))
            args.append(coef)
            in_bytes += int(coef.size) * 4

        cost = pl.CostEstimate(
            flops=2 * n_pad * n_pad * f_pad + 12 * n_pad * n_pad * self.kernel_num,
            transcendentals=self.kernel_num * n_pad * n_pad,
            bytes_accessed=in_bytes + num_tiles * 8 * 128 * 4)

        partials = pl.pallas_call(
            kernel,
            out_shape=out_shape,
            grid_spec=pltpu.PrefetchScalarGridSpec(
                num_scalar_prefetch=0,
                grid=(num_tiles,),
                in_specs=in_specs,
                out_specs=out_spec),
            compiler_params=pltpu.CompilerParams(
                dimension_semantics=("parallel",),
                vmem_limit_bytes=int(vmem_budget)),
            cost_estimate=cost,
        )(*args)

        scale = 1.0 if use_coef else 1.0 / float(b * b)   # mean over the [B,B] quadrant
        return jnp.sum(partials[:, 0, 0]) * scale


# ----------------------------- pure-JAX references -----------------------------
def _gaussian_kernel_ref(src, tar, kernel_mul=2.0, kernel_num=5, fix_sigma=None):
    total = jnp.concatenate([src, tar], axis=0)
    n = total.shape[0]
    diff = total[None, :, :] - total[:, None, :]
    l2 = jnp.sum(diff * diff, axis=2)
    bandwidth = fix_sigma if fix_sigma else jnp.sum(l2) / (n * n - n)
    bandwidth = bandwidth / (kernel_mul ** (kernel_num // 2))
    return sum(jnp.exp(-l2 / (bandwidth * kernel_mul ** i)) for i in range(kernel_num))


def _reference_mmd(src, tar, kernel_mul=2.0, kernel_num=5, fix_sigma=None):
    b = src.shape[0]
    kern = _gaussian_kernel_ref(src, tar, kernel_mul, kernel_num, fix_sigma)
    xx, yy = kern[:b, :b], kern[b:, b:]
    xy, yx = kern[:b, b:], kern[b:, :b]
    return jnp.mean(xx + yy - xy - yx)


def _reference_mmd_linear(src, tar, kernel_mul=2.0, kernel_num=5, fix_sigma=None):
    b = src.shape[0]
    kern = _gaussian_kernel_ref(src, tar, kernel_mul, kernel_num, fix_sigma)
    loss = 0.0
    for i in range(b):
        s1, s2 = i, (i + 1) % b
        t1, t2 = s1 + b, s2 + b
        loss = loss + kern[s1, s2] + kern[t1, t2]
        loss = loss - kern[s1, t2] - kern[s2, t1]
    return loss / float(b)


if __name__ == "__main__":
    key = jax.random.PRNGKey(0)
    k1, k2, k3, k4 = jax.random.split(key, 4)

    # f32 exp path -> tight-ish check; auto (bf16 on v6e/v7x) path -> loose check.
    F32_TOL = dict(rtol=1e-3, atol=1e-4)
    AUTO_TOL = dict(rtol=1e-1, atol=1e-2)

    # 1) Default 'mmd', B=8, F=32 (feature padding to 128 lanes), f32 exp.
    B, F = 8, 32
    src = jax.random.normal(k1, (B, F), dtype=jnp.float32)
    tar = jax.random.normal(k2, (B, F), dtype=jnp.float32) + 0.5
    loss = jax.block_until_ready(MMDLossPallas(exp_dtype=jnp.float32)(src, tar))
    ref = jax.block_until_ready(_reference_mmd(src, tar))
    assert jnp.allclose(loss, ref, **F32_TOL), (loss, ref)

    # 2) Auto exp dtype (bf16 exp on v6e/v7x, f32 on v5e) — reduced-precision check.
    loss_auto = jax.block_until_ready(MMDLossPallas()(src, tar))
    assert jnp.allclose(loss_auto, ref, **AUTO_TOL), (loss_auto, ref)

    # 3) Row-padding mask path (2B = 10 -> padded to 16 rows).
    B2, F2 = 5, 20
    src2 = jax.random.normal(jax.random.PRNGKey(1), (B2, F2), dtype=jnp.float32)
    tar2 = jax.random.normal(jax.random.PRNGKey(2), (B2, F2), dtype=jnp.float32) + 0.25
    loss2 = jax.block_until_ready(MMDLossPallas(exp_dtype=jnp.float32)(src2, tar2))
    ref2 = jax.block_until_ready(_reference_mmd(src2, tar2))
    assert jnp.allclose(loss2, ref2, **F32_TOL), (loss2, ref2)

    # 4) fix_sigma path (bandwidth reduction elided at trace time).
    loss_fs = jax.block_until_ready(
        MMDLossPallas(fix_sigma=4.0, exp_dtype=jnp.float32)(src, tar))
    ref_fs = jax.block_until_ready(_reference_mmd(src, tar, fix_sigma=4.0))
    assert jnp.allclose(loss_fs, ref_fs, **F32_TOL), (loss_fs, ref_fs)

    # 5) 'mmd_linear' variant (coef-matrix path).
    loss_lin = jax.block_until_ready(
        MMDLossPallas(mmd_type="mmd_linear", exp_dtype=jnp.float32)(src, tar))
    ref_lin = jax.block_until_ready(_reference_mmd_linear(src, tar))
    assert jnp.allclose(loss_lin, ref_lin, **F32_TOL), (loss_lin, ref_lin)

    # 6) Forced multi-tile path (grid=(2,), "parallel" row blocks, per-tile partials).
    B3, F3 = 128, 64
    src3 = jax.random.normal(k3, (B3, F3), dtype=jnp.float32)
    tar3 = jax.random.normal(k4, (B3, F3), dtype=jnp.float32) + 0.25
    loss3 = jax.block_until_ready(
        MMDLossPallas(exp_dtype=jnp.float32, tile_rows=128)(src3, tar3))
    ref3 = jax.block_until_ready(_reference_mmd(src3, tar3))
    assert jnp.allclose(loss3, ref3, **F32_TOL), (loss3, ref3)

    # 7) Forced multi-tile 'mmd_linear' (tiled coef row blocks).
    loss4 = jax.block_until_ready(
        MMDLossPallas(mmd_type="mmd_linear", exp_dtype=jnp.float32,
                      tile_rows=128)(src3, tar3))
    ref4 = jax.block_until_ready(_reference_mmd_linear(src3, tar3))
    assert jnp.allclose(loss4, ref4, **F32_TOL), (loss4, ref4)

    print("KERNEL_OK")
</pallas_src>

<mosaic_0001>
module attributes {stable_mosaic.version = 11 : i64} {
  func.func @_mmd_kernel(%arg0: i32, %arg1: memref<16x128xf32, #tpu.memory_space<vmem>>, %arg2: memref<1x8x128xf32, #tpu.memory_space<vmem>>) attributes {dimension_semantics = [#tpu.dimension_semantics<parallel>], iteration_bounds = array<i64: 1>, scalar_prefetch = 0 : i64, scratch_operands = 0 : i64, tpu.core_type = #tpu.core_type<tc>, window_params = [{pipeline_mode = #tpu.pipeline_mode<synchronous>, transform_indices = @transform_0, window_bounds = array<i64: 16, 128>}, {transform_indices = @transform_1, window_bounds = array<i64: 1, 8, 128>}]} {
    %c0 = arith.constant 0 : index
    %c0_0 = arith.constant 0 : index
    %0 = vector.load %arg1[%c0, %c0_0] : memref<16x128xf32, #tpu.memory_space<vmem>>, vector<16x128xf32>
    %1 = arith.mulf %0, %0 : vector<16x128xf32>
    %cst = arith.constant dense<0.000000e+00> : vector<16xf32>
    %2 = vector.multi_reduction <add>, %1, %cst [1] : vector<16x128xf32> to vector<16xf32>
    %3 = vector.shape_cast %2 : vector<16xf32> to vector<16x1xf32>
    %cst_1 = arith.constant dense<0.000000e+00> : vector<16x16xf32>
    %4 = tpu.matmul %0, %0, %cst_1 {dimension_numbers = #tpu.dot_dimension_numbers<[1], [1], [0], [0], [0, 0, 1, 0], [], []>} : vector<16x128xf32>, vector<16x128xf32>, vector<16x16xf32> -> vector<16x16xf32>
    %5 = tpu.transpose %3, [1, 0] : vector<16x1xf32> -> vector<1x16xf32>
    %6 = vector.broadcast %3 : vector<16x1xf32> to vector<16x16xf32>
    %7 = vector.broadcast %5 : vector<1x16xf32> to vector<16x16xf32>
    %8 = arith.addf %6, %7 : vector<16x16xf32>
    %cst_2 = arith.constant 2.000000e+00 : f32
    %9 = vector.broadcast %cst_2 : f32 to vector<16x16xf32>
    %10 = arith.mulf %9, %4 : vector<16x16xf32>
    %11 = arith.subf %8, %10 : vector<16x16xf32>
    %cst_3 = arith.constant 0.000000e+00 : f32
    %12 = vector.broadcast %cst_3 : f32 to vector<16x16xf32>
    %13 = arith.maximumf %11, %12 : vector<16x16xf32>
    %cst_4 = arith.constant dense<0.000000e+00> : vector<128xf32>
    %14 = vector.multi_reduction <add>, %0, %cst_4 [0] : vector<16x128xf32> to vector<128xf32>
    %15 = vector.shape_cast %14 : vector<128xf32> to vector<1x128xf32>
    %16 = vector.shape_cast %3 : vector<16x1xf32> to vector<1x16x1xf32>
    %cst_5 = arith.constant dense<0.000000e+00> : vector<1xf32>
    %17 = vector.multi_reduction <add>, %16, %cst_5 [1, 2] : vector<1x16x1xf32> to vector<1xf32>
    %18 = vector.shape_cast %17 : vector<1xf32> to vector<1x1x1xf32>
    %19 = vector.extract %18[0, 0, 0] : f32 from vector<1x1x1xf32>
    %cst_6 = arith.constant 3.200000e+01 : f32
    %20 = arith.mulf %cst_6, %19 : f32
    %21 = arith.mulf %15, %15 : vector<1x128xf32>
    %22 = vector.shape_cast %21 : vector<1x128xf32> to vector<1x1x128xf32>
    %cst_7 = arith.constant dense<0.000000e+00> : vector<1xf32>
    %23 = vector.multi_reduction <add>, %22, %cst_7 [1, 2] : vector<1x1x128xf32> to vector<1xf32>
    %24 = vector.shape_cast %23 : vector<1xf32> to vector<1x1x1xf32>
    %25 = vector.extract %24[0, 0, 0] : f32 from vector<1x1x1xf32>
    %cst_8 = arith.constant 2.000000e+00 : f32
    %26 = arith.mulf %cst_8, %25 : f32
    %27 = arith.subf %20, %26 : f32
    %cst_9 = arith.constant 2.400000e+02 : f32
    %28 = arith.divf %27, %cst_9 : f32
    %cst_10 = arith.constant 4.000000e+00 : f32
    %29 = arith.divf %28, %cst_10 : f32
    %cst_11 = arith.constant -1.000000e+00 : f32
    %30 = arith.divf %cst_11, %29 : f32
    %31 = tpu.iota {dimensions = array<i32: 0>} : vector<16x1xi32>
    %c0_i32 = arith.constant 0 : i32
    %32 = vector.broadcast %c0_i32 : i32 to vector<16x1xi32>
    %33 = arith.addi %32, %31 : vector<16x1xi32>
    %34 = tpu.iota {dimensions = array<i32: 1>} : vector<1x16xi32>
    %c8_i32 = arith.constant 8 : i32
    %35 = vector.broadcast %c8_i32 : i32 to vector<16x1xi32>
    %36 = arith.cmpi slt, %33, %35 : vector<16x1xi32>
    %c8_i32_12 = arith.constant 8 : i32
    %37 = vector.broadcast %c8_i32_12 : i32 to vector<1x16xi32>
    %38 = arith.cmpi slt, %34, %37 : vector<1x16xi32>
    %39 = vector.broadcast %36 : vector<16x1xi1> to vector<16x16xi1>
    %40 = vector.broadcast %38 : vector<1x16xi1> to vector<16x16xi1>
    %41 = vector.broadcast %39 : vector<16x16xi1> to vector<16x16xi1>
    %42 = vector.broadcast %40 : vector<16x16xi1> to vector<16x16xi1>
    %43 = arith.xori %41, %42 : vector<16x16xi1>
    %cst_13 = arith.constant dense<true> : vector<16x16xi1>
    %44 = arith.xori %43, %cst_13 : vector<16x16xi1>
    %cst_14 = arith.constant 5.000000e-01 : f32
    %cst_15 = arith.constant 0.000000e+00 : f32
    %c0_i32_16 = arith.constant 0 : i32
    %45 = vector.broadcast %30 : f32 to vector<16x16xf32>
    %46 = arith.mulf %13, %45 : vector<16x16xf32>
    %47 = math.exp %46 : vector<16x16xf32>
    %cst_17 = arith.constant 0.000000e+00 : f32
    %48 = vector.broadcast %cst_17 : f32 to vector<16x16xf32>
    %49 = arith.subf %48, %47 : vector<16x16xf32>
    %50 = arith.select %44, %47, %49 : vector<16x16xi1>, vector<16x16xf32>
    %51 = vector.shape_cast %50 : vector<16x16xf32> to vector<1x16x16xf32>
    %cst_18 = arith.constant dense<0.000000e+00> : vector<1xf32>
    %52 = vector.multi_reduction <add>, %51, %cst_18 [1, 2] : vector<1x16x16xf32> to vector<1xf32>
    %53 = vector.shape_cast %52 : vector<1xf32> to vector<1x1x1xf32>
    %54 = vector.extract %53[0, 0, 0] : f32 from vector<1x1x1xf32>
    %55 = arith.addf %cst_15, %54 : f32
    %56 = arith.mulf %30, %cst_14 : f32
    %c1_i32 = arith.constant 1 : i32
    %57 = vector.broadcast %56 : f32 to vector<16x16xf32>
    %58 = arith.mulf %13, %57 : vector<16x16xf32>
    %59 = math.exp %58 : vector<16x16xf32>
    %cst_19 = arith.constant 0.000000e+00 : f32
    %60 = vector.broadcast %cst_19 : f32 to vector<16x16xf32>
    %61 = arith.subf %60, %59 : vector<16x16xf32>
    %62 = arith.select %44, %59, %61 : vector<16x16xi1>, vector<16x16xf32>
    %63 = vector.shape_cast %62 : vector<16x16xf32> to vector<1x16x16xf32>
    %cst_20 = arith.constant dense<0.000000e+00> : vector<1xf32>
    %64 = vector.multi_reduction <add>, %63, %cst_20 [1, 2] : vector<1x16x16xf32> to vector<1xf32>
    %65 = vector.shape_cast %64 : vector<1xf32> to vector<1x1x1xf32>
    %66 = vector.extract %65[0, 0, 0] : f32 from vector<1x1x1xf32>
    %67 = arith.addf %55, %66 : f32
    %68 = arith.mulf %56, %cst_14 : f32
    %c2_i32 = arith.constant 2 : i32
    %69 = vector.broadcast %68 : f32 to vector<16x16xf32>
    %70 = arith.mulf %13, %69 : vector<16x16xf32>
    %71 = math.exp %70 : vector<16x16xf32>
    %cst_21 = arith.constant 0.000000e+00 : f32
    %72 = vector.broadcast %cst_21 : f32 to vector<16x16xf32>
    %73 = arith.subf %72, %71 : vector<16x16xf32>
    %74 = arith.select %44, %71, %73 : vector<16x16xi1>, vector<16x16xf32>
    %75 = vector.shape_cast %74 : vector<16x16xf32> to vector<1x16x16xf32>
    %cst_22 = arith.constant dense<0.000000e+00> : vector<1xf32>
    %76 = vector.multi_reduction <add>, %75, %cst_22 [1, 2] : vector<1x16x16xf32> to vector<1xf32>
    %77 = vector.shape_cast %76 : vector<1xf32> to vector<1x1x1xf32>
    %78 = vector.extract %77[0, 0, 0] : f32 from vector<1x1x1xf32>
    %79 = arith.addf %67, %78 : f32
    %80 = arith.mulf %68, %cst_14 : f32
    %c3_i32 = arith.constant 3 : i32
    %81 = vector.broadcast %80 : f32 to vector<16x16xf32>
    %82 = arith.mulf %13, %81 : vector<16x16xf32>
    %83 = math.exp %82 : vector<16x16xf32>
    %cst_23 = arith.constant 0.000000e+00 : f32
    %84 = vector.broadcast %cst_23 : f32 to vector<16x16xf32>
    %85 = arith.subf %84, %83 : vector<16x16xf32>
    %86 = arith.select %44, %83, %85 : vector<16x16xi1>, vector<16x16xf32>
    %87 = vector.shape_cast %86 : vector<16x16xf32> to vector<1x16x16xf32>
    %cst_24 = arith.constant dense<0.000000e+00> : vector<1xf32>
    %88 = vector.multi_reduction <add>, %87, %cst_24 [1, 2] : vector<1x16x16xf32> to vector<1xf32>
    %89 = vector.shape_cast %88 : vector<1xf32> to vector<1x1x1xf32>
    %90 = vector.extract %89[0, 0, 0] : f32 from vector<1x1x1xf32>
    %91 = arith.addf %79, %90 : f32
    %92 = arith.mulf %80, %cst_14 : f32
    %c4_i32 = arith.constant 4 : i32
    %93 = vector.broadcast %92 : f32 to vector<16x16xf32>
    %94 = arith.mulf %13, %93 : vector<16x16xf32>
    %95 = math.exp %94 : vector<16x16xf32>
    %cst_25 = arith.constant 0.000000e+00 : f32
    %96 = vector.broadcast %cst_25 : f32 to vector<16x16xf32>
    %97 = arith.subf %96, %95 : vector<16x16xf32>
    %98 = arith.select %44, %95, %97 : vector<16x16xi1>, vector<16x16xf32>
    %99 = vector.shape_cast %98 : vector<16x16xf32> to vector<1x16x16xf32>
    %cst_26 = arith.constant dense<0.000000e+00> : vector<1xf32>
    %100 = vector.multi_reduction <add>, %99, %cst_26 [1, 2] : vector<1x16x16xf32> to vector<1xf32>
    %101 = vector.shape_cast %100 : vector<1xf32> to vector<1x1x1xf32>
    %102 = vector.extract %101[0, 0, 0] : f32 from vector<1x1x1xf32>
    %103 = arith.addf %91, %102 : f32
    %104 = arith.mulf %92, %cst_14 : f32
    %cst_27 = arith.constant 0.000000e+00 : f32
    %105 = vector.broadcast %cst_27 : f32 to vector<1x8x128xf32>
    %106 = vector.broadcast %103 : f32 to vector<1x8x128xf32>
    %107 = arith.addf %105, %106 : vector<1x8x128xf32>
    %c0_28 = arith.constant 0 : index
    %c0_29 = arith.constant 0 : index
    %c0_30 = arith.constant 0 : index
    %108 = vector.load %arg2[%c0_28, %c0_29, %c0_30] : memref<1x8x128xf32, #tpu.memory_space<vmem>>, vector<1x8x128xf32>
    tpu.vector_store %arg2[%c0_28, %c0_29, %c0_30], %107 {strides = array<i32>} : memref<1x8x128xf32, #tpu.memory_space<vmem>>, vector<1x8x128xf32>,
    return
  }
  func.func @transform_0(%arg0: i32) -> (i32, i32) {
    %c0_i32 = arith.constant 0 : i32
    %c0_i32_0 = arith.constant 0 : i32
    %c0_i32_1 = arith.constant 0 : i32
    return %c0_i32, %c0_i32_0 : i32, i32
  }
  func.func @transform_1(%arg0: i32) -> (i32, i32, i32) {
    %c0_i32 = arith.constant 0 : i32
    %c0_i32_0 = arith.constant 0 : i32
    %c0_i32_1 = arith.constant 0 : i32
    return %arg0, %c0_i32, %c0_i32_0 : i32, i32, i32
  }
}

</mosaic_0001>

<bundles_post_ra>
// kernel: tpu_custom_call.1
= control target key start
LH: loop header
LB: loop body
LE: loop exit
PB: predicated region body
PF: predicated region fallthrough
CT: control target
= control target key end

     0   :  { %6 = vsyncpa [#allocation3], 0  ;;  %s542_s0 = inlined_call_operand.hbm [shape: f32[16,128], index: 0, kind: input, shape index: {}]   ;;  %s543_s1 = inlined_call_operand.hbm [shape: f32[1,8,128], index: 1, kind: output, shape index: {}]  }
   0x1   :  { %7 = vsyncpa [#allocation4], 0  ;;  %s463_s6 = smov [#allocation2]   ;;  %s415_s10 = scalar_lea.hbm %s542_s0, 256 }
   0x2   :  { %s13_s7 = sshll.u32 %s463_s6, 4  ;;  %p416_p0 = scmp.ne.s32.totalorder %s542_s0, %s415_s10  ;;  %s14_s7 = int_to_ptr.vmem [resolvable:$true] %s13_s7 }
   0x3   :  { %p419_p1 = scmp.lt.u32.totalorder %s415_s10, %s542_s0 }
   0x5   :  { %p421_p2 = pnand %p419_p1, %p416_p0 }
   0x7   :  { %424 = shalt.err (!%p421_p2)
}
   0x8   :  { %s425_s15 = scalar_lea.vmem %s14_s7, 256  ;;  %p430_p4 = scmp.lt.s32.totalorder %s14_s7, %s14_s7 }
   0x9   :  { %p426_p3 = scmp.ne.s32.totalorder %s14_s7, %s425_s15  ;;  %p431_p5 = scmp.lt.s32.totalorder %s425_s15, %s425_s15 }
   0xb   :  { %p432_p6 = por %p431_p5, %p430_p4 }
   0xd   :  { %p433_p7 = pnand %p432_p6, %p426_p3 }
   0xf   :  { %436 = shalt.err (!%p433_p7)
}
  0x10   :  { %s464_s16 = smov 128   ;;  %s465_s17 = smov 8  }
  0x11   :  { %19 = dma.hbm_to_vmem [thread:$0]  %s542_s0, 256, %s14_s7, [#allocation3], %s464_s16, %s464_s16, %s465_s17  }
  0x12   :  { %459 = dma.done.wait [#allocation3], 256  }
  0x13   :  { %460 = vsyncadd [#allocation3], 4294967040  ;;  %v23_v0 = vld [vmem:[#allocation2] sm:$0xff]  ;;  %v24_v1 = vld [vmem:[#allocation2 + $0x8] sm:$0xff]  ;;  %vm157_vm0 = vcmask 7168   ;;  %vm172_vm1 = vcmask 1040384   ;;  %v138_v37 = vlaneseq }
  0x14   :  { %v25_v2 = vmul.f32 %v23_v0, %v23_v0  ;;  %v367_v3 = vpack.c.bf16 %v24_v1, %v23_v0  ;;  %364 = vmatprep.mubr.f32.mxu0 %v23_v0  ;;  %v26_v4 = vmul.f32 %v24_v1, %v24_v1  ;;  %v150_v5 = vadd.f32 %v24_v1, %v23_v0  ;;  %s467_s10 = smov [#allocation5]  }
  0x15   :  { %v139_v38 = vshrl.u32 %v138_v37, 7  ;;  %v199_v58 = vand.u32 127, %v138_v37  ;;  %vm466_vm3 = vmmov 1   ;;  %vm224_vm7 = vcmask 130048   ;;  %s347_s11 = sshll.u32 %s467_s10, 4  ;;  %s348_s11 = int_to_ptr.vmem [resolvable:$true] %s347_s11 }
  0x16   :  { %27 = vadd.xlane.f32.xlu0 %v25_v2  ;;  %368 = vmatprep.subr.bf16.mxu0 %v367_v3  ;;  %v151_v6 = vrot.slane %v150_v5, 4  ;;  %s437_s14 = scalar_lea.vmem %s348_s11, 128  ;;  %p442_p9 = scmp.lt.s32.totalorder %s348_s11, %s348_s11 }
  0x17   :  { %370 = vmatpush3.bf16.xpose.msra.mxu0 %v367_v3  ;;  %v140_v39 = vsub.s32 0, %v139_v38  ;;  %vm202_vm2 = vcmp.lt.s32.totalorder %v199_v58, 8  ;;  %p438_p8 = scmp.ne.s32.totalorder %s348_s11, %s437_s14  ;;  %p443_p10 = scmp.lt.s32.totalorder %s437_s14, %s437_s14 }
  0x18   :  { %v152_v7 = vadd.f32 %v151_v6, %v150_v5  ;;  %vm209_vm4 = vmxor %vm466_vm3, %vm202_vm2 }
  0x19   :  { %vm491_vm5 = vmxor %vm209_vm4, %vm466_vm3  ;;  %p444_p11 = por %p443_p10, %p442_p9 }
  0x1a   :  { %29 = vadd.xlane.f32.xlu0 %v26_v4  ;;  %v153_v8 = vrot.slane %v152_v7, 2  ;;  %vm496_vm6 = vmxor %vm202_vm2, %vm466_vm3 }
  0x1b   :  { %p445_p12 = pnand %p444_p11, %p438_p8 }
  0x1c   :  { %v154_v9 = vadd.f32 %v153_v8, %v152_v7 }
  0x1e   :  { %365 = vmatmul.mubr.f32.vlgmr.msra.gmra.mrb[0].mxu0 %v24_v1  ;;  %v155_v10 = vrot.slane %v154_v9, 1 }
  0x20   :  { %v156_v12 = vadd.f32 %v155_v10, %v154_v9 }
  0x22   :  { %v171_v16 = vmul.f32 %v156_v12, %v156_v12 }
  0x24   :  { %v173_v18 = vsel %vm172_vm1, %v171_v16, 0.0 }
  0xa3   :  { %v28_v11 = vpop.xlane.xlu0 %27 }
  0xa4   :  { %106 = vxpose.xlu0.b32.start [1/2] (short) (narrow) %v28_v11, 8  ;;  %v158_v14 = vsel %vm157_vm0, %v28_v11, 0.0 }
  0xa7   :  { %v30_v13 = vpop.xlane.xlu0 %29 }
  0xa8   :  { %107 = vxpose.xlu0.b32.end [2/2] (short) (narrow) %v30_v13, 8  ;;  %v159_v15 = vsel %vm157_vm0, %v30_v13, 0.0 }
  0xa9   :  { %v160_v17 = vadd.f32 %v159_v15, %v158_v14 }
  0xab   :  { %161 = vadd.xlane.f32.xlu1 %v160_v17 }
  0xaf   :  { %174 = vadd.xlane.f32.xlu1 %v173_v18 }
  0xf1   :  { %v366_v19 = vpop.f32.mrb[0].mxu0 }
  0xf2   :  { %v97_v20 = vpop.f32.mrb[1].mxu0  ;;  %v145_v44 = vmul.f32 2.0, %v366_v19 }
  0xf3   :  { %v144_v45 = vmul.f32 2.0, %v97_v20 }
 0x124   :  { %v122_v40 = vpop.trf.xlu0 }
 0x125   :  { %v141_v41 = vrot.slane %v122_v40, %v140_v39 }
 0x127   :  { %v142_v42 = vadd.f32 %v141_v41, %v28_v11  ;;  %v143_v43 = vadd.f32 %v141_v41, %v30_v13 }
 0x129   :  { %v147_v46 = vsub.f32 %v143_v43, %v145_v44  ;;  %v146_v47 = vsub.f32 %v142_v42, %v144_v45 }
 0x12b   :  { %v149_v48 = vmax.f32 %v147_v46, 0.0  ;;  %v148_v49 = vmax.f32 %v146_v47, 0.0 }
 0x138   :  { %v162_v21 = vpop.xlane.xlu1 %161 }
 0x139   :  { %v163_v22 = vrot.slane %v162_v21, 4 }
 0x13b   :  { %v164_v23 = vadd.f32 %v163_v22, %v162_v21 }
 0x13c   :  { %v175_v24 = vpop.xlane.xlu1 %174 }
 0x13d   :  { %v165_v25 = vrot.slane %v164_v23, 2  ;;  %v176_v26 = vrot.slane %v175_v24, 4 }
 0x13f   :  { %v177_v27 = vadd.f32 %v176_v26, %v175_v24  ;;  %v166_v28 = vadd.f32 %v165_v25, %v164_v23 }
 0x141   :  { %v178_v29 = vrot.slane %v177_v27, 2  ;;  %v167_v30 = vrot.slane %v166_v28, 1 }
 0x143   :  { %v168_v31 = vadd.f32 %v167_v30, %v166_v28  ;;  %v179_v32 = vadd.f32 %v178_v29, %v177_v27 }
 0x145   :  { %371 = vpush %v168_v31  ;;  %v180_v33 = vrot.slane %v179_v32, 1 }
 0x147   :  { %v181_v34 = vadd.f32 %v180_v33, %v179_v32 }
 0x149   :  { %373 = vpush %v181_v34 }
 0x176   :  { %s372_s0 = spop %371 }
 0x177   :  { %s170_s20 = smul.f32 32.0, %s372_s0 }
 0x17a   :  { %s374_s21 = spop %373 }
 0x17b   :  { %s183_s22 = smul.f32 2.0, %s374_s21 }
 0x17d   :  { %s184_s23 = ssub.f32 %s170_s20, %s183_s22 }
 0x17f   :  { %s187_s24 = smul.f32 0.004166667, %s184_s23 }
 0x181   :  { %s190_s25 = smul.f32 0.25, %s187_s24 }
 0x183   :  { %v191_v35 = vstv %s190_s25 }
 0x184   :  { %393 = vrcp.f32 %v191_v35 }
 0x18e   :  { %v394_v36 = vpop.eup %393 }
 0x18f   :  { %375 = vpush %v394_v36 }
 0x1c0   :  { %s376_s26 = spop %375 }
 0x1c1   :  { %s194_s27 = smul.f32 -1.0, %s376_s26 }
 0x1c3   :  { %v213_v50 = vstv %s194_s27  ;;  %s238_s28 = smul.f32 0.5, %s194_s27 }
 0x1c4   :  { %v214_v51 = vmul.f32 %v213_v50, %v148_v49  ;;  %v215_v52 = vmul.f32 %v213_v50, %v149_v48 }
 0x1c5   :  { %v239_v53 = vstv %s238_s28  ;;  %s263_s29 = smul.f32 0.5, %s238_s28 }
 0x1c6   :  { %v216_v54 = vmul.f32 1.442695, %v214_v51  ;;  %v218_v55 = vmul.f32 1.442695, %v215_v52  ;;  %v240_v56 = vmul.f32 %v239_v53, %v148_v49  ;;  %v241_v57 = vmul.f32 %v239_v53, %v149_v48 }
 0x1c7   :  { %v264_v59 = vstv %s263_s29  ;;  %s288_s30 = smul.f32 0.5, %s263_s29 }
 0x1c8   :  { %395 = vpow2.f32 %v216_v54  ;;  %v242_v60 = vmul.f32 1.442695, %v240_v56  ;;  %v244_v61 = vmul.f32 1.442695, %v241_v57  ;;  %v265_v62 = vmul.f32 %v264_v59, %v148_v49 }
 0x1c9   :  { %397 = vpow2.f32 %v218_v55  ;;  %v266_v63 = vmul.f32 %v264_v59, %v149_v48  ;;  %v289_v0 = vstv %s288_s30  ;;  %s313_s2 = smul.f32 0.5, %s288_s30 }
 0x1ca   :  { %399 = vpow2.f32 %v242_v60  ;;  %v267_v1 = vmul.f32 1.442695, %v265_v62  ;;  %v290_v2 = vmul.f32 %v289_v0, %v148_v49  ;;  %v291_v3 = vmul.f32 %v289_v0, %v149_v48 }
 0x1cb   :  { %401 = vpow2.f32 %v244_v61  ;;  %v269_v4 = vmul.f32 1.442695, %v266_v63  ;;  %v314_v5 = vstv %s313_s2 }
 0x1cc   :  { %403 = vpow2.f32 %v267_v1  ;;  %v292_v6 = vmul.f32 1.442695, %v290_v2  ;;  %v294_v7 = vmul.f32 1.442695, %v291_v3  ;;  %v315_v8 = vmul.f32 %v314_v5, %v148_v49 }
 0x1cd   :  { %405 = vpow2.f32 %v269_v4  ;;  %v316_v9 = vmul.f32 %v314_v5, %v149_v48 }
 0x1ce   :  { %407 = vpow2.f32 %v292_v6  ;;  %v317_v10 = vmul.f32 1.442695, %v315_v8 }
 0x1cf   :  { %409 = vpow2.f32 %v294_v7  ;;  %v319_v11 = vmul.f32 1.442695, %v316_v9 }
 0x1d0   :  { %411 = vpow2.f32 %v317_v10 }
 0x1d1   :  { %413 = vpow2.f32 %v319_v11 }
 0x1d2   :  { %v396_v12 = vpop.eup %395 }
 0x1d3   :  { %v398_v14 = vpop.eup %397  ;;  %v220_v16 = vsub.f32 0.0, %v396_v12 }
 0x1d4   :  { %v400_v17 = vpop.eup %399  ;;  %v221_v18 = vsub.f32 0.0, %v398_v14 }
 0x1d5   :  { %v402_v19 = vpop.eup %401  ;;  %v222_v20 = vsel %vm491_vm5, %v396_v12, %v220_v16  ;;  %v246_v21 = vsub.f32 0.0, %v400_v17 }
 0x1d6   :  { %v404_v22 = vpop.eup %403  ;;  %v223_v23 = vsel %vm496_vm6, %v398_v14, %v221_v18  ;;  %v225_v24 = vsel %vm224_vm7, %v222_v20, 0.0  ;;  %v247_v25 = vsub.f32 0.0, %v402_v19 }
 0x1d7   :  { %v406_v26 = vpop.eup %405  ;;  %v226_v27 = vsel %vm224_vm7, %v223_v23, 0.0  ;;  %v248_v28 = vsel %vm491_vm5, %v400_v17, %v246_v21  ;;  %v271_v29 = vsub.f32 0.0, %v404_v22 }
 0x1d8   :  { %v408_v30 = vpop.eup %407  ;;  %v227_v31 = vadd.f32 %v226_v27, %v225_v24  ;;  %v249_v32 = vsel %vm496_vm6, %v402_v19, %v247_v25  ;;  %v250_v33 = vsel %vm224_vm7, %v248_v28, 0.0  ;;  %v272_v34 = vsub.f32 0.0, %v406_v26 }
 0x1d9   :  { %v410_v35 = vpop.eup %409  ;;  %v251_v36 = vsel %vm224_vm7, %v249_v32, 0.0  ;;  %v273_v37 = vsel %vm491_vm5, %v404_v22, %v271_v29  ;;  %v296_v38 = vsub.f32 0.0, %v408_v30 }
 0x1da   :  { %v412_v39 = vpop.eup %411  ;;  %228 = vadd.xlane.f32.xlu1 %v227_v31  ;;  %v252_v40 = vadd.f32 %v251_v36, %v250_v33  ;;  %v274_v41 = vsel %vm496_vm6, %v406_v26, %v272_v34  ;;  %v275_v42 = vsel %vm224_vm7, %v273_v37, 0.0  ;;  %v297_v43 = vsub.f32 0.0, %v410_v35 }
 0x1db   :  { %v414_v44 = vpop.eup %413  ;;  %v276_v45 = vsel %vm224_vm7, %v274_v41, 0.0  ;;  %v298_v46 = vsel %vm491_vm5, %v408_v30, %v296_v38  ;;  %v321_v47 = vsub.f32 0.0, %v412_v39 }
 0x1dc   :  { %v277_v48 = vadd.f32 %v276_v45, %v275_v42  ;;  %v299_v49 = vsel %vm496_vm6, %v410_v35, %v297_v43  ;;  %v300_v50 = vsel %vm224_vm7, %v298_v46, 0.0  ;;  %v322_v51 = vsub.f32 0.0, %v414_v44 }
 0x1dd   :  { %v301_v52 = vsel %vm224_vm7, %v299_v49, 0.0  ;;  %v323_v53 = vsel %vm491_vm5, %v412_v39, %v321_v47 }
 0x1de   :  { %253 = vadd.xlane.f32.xlu1 %v252_v40  ;;  %v302_v54 = vadd.f32 %v301_v52, %v300_v50  ;;  %v324_v55 = vsel %vm496_vm6, %v414_v44, %v322_v51  ;;  %v325_v56 = vsel %vm224_vm7, %v323_v53, 0.0 }
 0x1df   :  { %v326_v57 = vsel %vm224_vm7, %v324_v55, 0.0 }
 0x1e0   :  { %v327_v58 = vadd.f32 %v326_v57, %v325_v56 }
 0x1e2   :  { %278 = vadd.xlane.f32.xlu1 %v277_v48 }
 0x1e6   :  { %303 = vadd.xlane.f32.xlu1 %v302_v54 }
 0x1ea   :  { %328 = vadd.xlane.f32.xlu1 %v327_v58 }
 0x267   :  { %v229_v59 = vpop.xlane.xlu1 %228 }
 0x268   :  { %v230_v60 = vrot.slane %v229_v59, 4 }
 0x26a   :  { %v231_v61 = vadd.f32 %v230_v60, %v229_v59 }
 0x26b   :  { %v254_v62 = vpop.xlane.xlu1 %253 }
 0x26c   :  { %v232_v63 = vrot.slane %v231_v61, 2  ;;  %v255_v0 = vrot.slane %v254_v62, 4 }
 0x26e   :  { %v256_v1 = vadd.f32 %v255_v0, %v254_v62  ;;  %v233_v2 = vadd.f32 %v232_v63, %v231_v61 }
 0x26f   :  { %v279_v3 = vpop.xlane.xlu1 %278 }
 0x270   :  { %v257_v4 = vrot.slane %v256_v1, 2  ;;  %v280_v5 = vrot.slane %v279_v3, 4  ;;  %v234_v6 = vrot.slane %v233_v2, 1 }
 0x272   :  { %v281_v7 = vadd.f32 %v280_v5, %v279_v3  ;;  %v235_v8 = vadd.f32 %v234_v6, %v233_v2  ;;  %v258_v9 = vadd.f32 %v257_v4, %v256_v1 }
 0x273   :  { %v304_v10 = vpop.xlane.xlu1 %303 }
 0x274   :  { %v282_v11 = vrot.slane %v281_v7, 2  ;;  %v305_v12 = vrot.slane %v304_v10, 4  ;;  %377 = vpush %v235_v8  ;;  %v259_v13 = vrot.slane %v258_v9, 1 }
 0x276   :  { %v306_v14 = vadd.f32 %v305_v12, %v304_v10  ;;  %v260_v15 = vadd.f32 %v259_v13, %v258_v9  ;;  %v283_v16 = vadd.f32 %v282_v11, %v281_v7 }
 0x277   :  { %v329_v17 = vpop.xlane.xlu1 %328 }
 0x278   :  { %v307_v18 = vrot.slane %v306_v14, 2  ;;  %v330_v19 = vrot.slane %v329_v17, 4  ;;  %379 = vpush %v260_v15  ;;  %v284_v20 = vrot.slane %v283_v16, 1 }
 0x27a   :  { %v331_v21 = vadd.f32 %v330_v19, %v329_v17  ;;  %v285_v22 = vadd.f32 %v284_v20, %v283_v16  ;;  %v308_v23 = vadd.f32 %v307_v18, %v306_v14 }
 0x27c   :  { %v332_v24 = vrot.slane %v331_v21, 2  ;;  %381 = vpush %v285_v22  ;;  %v309_v25 = vrot.slane %v308_v23, 1 }
 0x27e   :  { %v333_v26 = vadd.f32 %v332_v24, %v331_v21  ;;  %v310_v27 = vadd.f32 %v309_v25, %v308_v23 }
 0x280   :  { %383 = vpush %v310_v27  ;;  %v334_v28 = vrot.slane %v333_v26, 1 }
 0x282   :  { %v335_v29 = vadd.f32 %v334_v28, %v333_v26 }
 0x284   :  { %385 = vpush %v335_v29 }
 0x2a5   :  { %s378_s3 = spop %377 }
 0x2a9   :  { %s380_s4 = spop %379 }
 0x2aa   :  { %s262_s6 = sadd.f32 %s380_s4, %s378_s3 }
 0x2ad   :  { %s382_s5 = spop %381 }
 0x2ae   :  { %s287_s8 = sadd.f32 %s382_s5, %s262_s6 }
 0x2b1   :  { %s384_s7 = spop %383 }
 0x2b2   :  { %s312_s9 = sadd.f32 %s384_s7, %s287_s8 }
 0x2b5   :  { %s386_s12 = spop %385 }
 0x2b6   :  { %s337_s13 = sadd.f32 %s386_s12, %s312_s9 }
 0x2b8   :  { %v338_v30 = vstv %s337_s13 }
 0x2b9   :  { %340 = vst [vmem:[#allocation5] sm:$0xff] %v338_v30 }
 0x2ba   :  { %448 = shalt.err (!%p445_p12)
}
 0x2bb   :  { %s449_s17 = scalar_lea.hbm %s543_s1, 128 }
 0x2bc   :  { %p450_p13 = scmp.ne.s32.totalorder %s543_s1, %s449_s17  ;;  %p453_p0 = scmp.lt.u32.totalorder %s449_s17, %s543_s1 }
 0x2be   :  { %p455_p1 = pnand %p453_p0, %p450_p13 }
 0x2c0   :  { %458 = shalt.err (!%p455_p1)
}
 0x2c1   :  { %350 = dma.vmem_to_hbm [thread:$0]  %s348_s11, 128, %s543_s1, [#allocation4]  }
 0x2c2   :  { %461 = dma.done.wait [#allocation4], 128  }
 0x2c3   :  { %462 = vsyncadd [#allocation4], 4294967168 }
 0x2c4   :  { %354 = vsyncpa [#allocation3], 1 }
 0x2c5   :  { %355 = vsyncpa [#allocation4], 1 }

</bundles_post_ra>
